<compile_context>
chip_gen: v7x
topology: tpu7x:2x2x1
jax: 0.10.0
libtpu: 0.0.40
codegen_flags: <defaults>
</compile_context>

<pallas_src>
import jax
import jax.numpy as jnp
from jax.experimental import pallas as pl
from jax.experimental.pallas import tpu as pltpu

MIB = 1024 * 1024


def _round_up(x, m):
    return (x + m - 1) // m * m


def _vmem_params():
    """Generation-aware scoped-VMEM limit and tile-chooser budget."""
    try:
        phys = int(pltpu.get_tpu_info().vmem_capacity_bytes)
    except Exception:
        phys = 64 * MIB                      # conservative (v7x-class) fallback
    if phys <= 64 * MIB:                     # v7x: 64 MiB/TC -> leave compiler headroom
        limit = 48 * MIB
    else:                                    # v5e / v6e: 128 MiB physical
        limit = 100 * MIB
    budget = limit - 8 * MIB                 # headroom inside the scoped limit
    return budget, limit, phys


def _choose_batch_tile(B, stream_row_bytes, interm_row_bytes, resident_bytes,
                       budget_bytes, prefer_split=True):
    """Largest rule-compliant batch tile whose working set fits the VMEM budget.

    Compliant tiles are multiples of 8 that divide B (sublane rule for the
    (TB, H) / (TB, 1) output blocks), or B itself (block == full array dim).
    The tile is capped at B//2 when possible so the batch grid has >= 2 steps
    (pipelining + both v7x TensorCores)."""
    def working(tb):
        return 2 * tb * stream_row_bytes + tb * interm_row_bytes + resident_bytes

    cands = {B}
    t = 8
    while t <= B:
        if B % t == 0:
            cands.add(t)
        t += 8
    cands = sorted(cands, reverse=True)

    cap = B
    if prefer_split and B >= 16 and any(c <= B // 2 for c in cands):
        cap = B // 2

    for tb in cands:                          # largest first
        if tb <= cap and working(tb) <= budget_bytes:
            return int(tb)
    return int(cands[-1])                     # smallest compliant tile (best effort)


# ----------------------------------------------------------------------------
# Kernel 1: prompt theta MLP (tiny, single invocation, everything in VMEM)
#   theta = rep_l2(relu(rep_l1(rep_theta)))
# ----------------------------------------------------------------------------
def _theta_kernel(theta_ref, w1_ref, b1_ref, w2_ref, b2_ref, out_ref):
    f32 = jnp.float32
    h = jnp.dot(theta_ref[...].astype(f32), w1_ref[...].astype(f32),
                preferred_element_type=f32)
    h = jnp.maximum(h + b1_ref[...].astype(f32), 0.0)           # (hlen, hsize_p)
    th = jnp.dot(h, w2_ref[...].astype(f32),
                 preferred_element_type=f32) + b2_ref[...].astype(f32)
    out_ref[...] = th.astype(out_ref.dtype)                     # (hlen, H)


# ----------------------------------------------------------------------------
# Kernel 2: ranking head, tiled over the batch axis
#   x1 = mean_seq(q_reps[-1]) ; x2 = mean_seq(d_reps[-1])   (AdaptiveAvgPool2d)
#   x  = max(x1, x2) ; feature = res(x) + x ; score = cls(feature)
# ----------------------------------------------------------------------------
def _rank_kernel(q_ref, d_ref, res_w_ref, res_b_ref, cls_w_ref, cls_b_ref,
                 score_ref, feat_ref):
    f32 = jnp.float32
    inv_q = 1.0 / q_ref.shape[1]
    inv_d = 1.0 / d_ref.shape[1]
    # Fused-cast f32 accumulation (no materialized f32 copy of the bf16 tiles).
    x1 = jnp.sum(q_ref[...], axis=1, dtype=f32) * inv_q         # (TB, H) seq-mean
    x2 = jnp.sum(d_ref[...], axis=1, dtype=f32) * inv_d         # (TB, H)
    x = jnp.maximum(x1, x2)                                     # (TB, H)

    feat = jnp.dot(x, res_w_ref[...].astype(f32), preferred_element_type=f32)
    feat = feat + res_b_ref[...].astype(f32) + x                # residual
    feat_ref[...] = feat.astype(feat_ref.dtype)

    # cls projection: VPU multiply + lane reduction -> (TB, 1). Avoids a
    # degenerate (H, 1) MXU tile; store block is (TB, 1) (lane dim == full dim).
    score = jnp.sum(feat * cls_w_ref[...].astype(f32), axis=1, keepdims=True)
    score_ref[...] = (score + cls_b_ref[...].astype(f32)).astype(score_ref.dtype)


def p0_twin_bert_ranker_forward(rep_theta, w1, b1, w2, b2,
                                q_reps, d_reps, res_w, res_b, cls_w, cls_b,
                                *, batch_tile=None):
    """Returns (theta, score, feature) matching the qd=True branch of forward()."""
    hlen, H = rep_theta.shape
    hsize = w1.shape[1]
    B, QL, _ = q_reps.shape
    _, DL, _ = d_reps.shape

    # --- theta MLP (hoisted out of the batch grid) -------------------------------
    # Zero-pad hsize to a multiple of 128: exact (ReLU(0)=0, zero rows of w2 add 0)
    # and keeps the theta intermediate / b1 broadcast full-lane.
    hsize_p = _round_up(hsize, 128)
    if hsize_p != hsize:
        pad = hsize_p - hsize
        w1 = jnp.pad(w1, ((0, 0), (0, pad)))
        b1 = jnp.pad(b1, ((0, pad),))
        w2 = jnp.pad(w2, ((0, pad), (0, 0)))

    theta = pl.pallas_call(
        _theta_kernel,
        out_shape=jax.ShapeDtypeStruct((hlen, H), jnp.float32),
    )(rep_theta, w1, b1.reshape(1, hsize_p), w2, b2.reshape(1, H))

    # --- ranking head ------------------------------------------------------------
    res_b_2d = res_b.reshape(1, H)
    cls_w_row = cls_w.reshape(1, H)        # == torch nn.Linear(H,1).weight layout
    cls_b_2d = cls_b.reshape(1, 1)

    in_itemsize = jnp.dtype(q_reps.dtype).itemsize
    # Per batch-row streamed bytes (double-buffered): q/d in + feature/score out.
    stream_row_bytes = (QL + DL) * H * in_itemsize + H * 4 + 4
    # Per batch-row f32 intermediates (x1, x2, x, feat), single copy.
    interm_row_bytes = 4 * H * 4
    # Resident constants, double-buffered by the default pipeliner.
    resident_bytes = 2 * 4 * (H * H + H + H + 1)

    budget, gen_limit, phys = _vmem_params()
    if batch_tile is not None:
        TB = int(batch_tile)
        assert B % TB == 0, "batch tile must divide the batch"
        assert TB % 8 == 0 or TB == B, "batch tile must be a multiple of 8 (or == B)"
    else:
        TB = _choose_batch_tile(B, stream_row_bytes, interm_row_bytes,
                                resident_bytes, budget)
    G = B // TB

    work = 2 * TB * stream_row_bytes + TB * interm_row_bytes + resident_bytes
    vmem_limit = int(max(gen_limit, min(work + 8 * MIB, phys - 4 * MIB)))

    flops = int(2 * B * H * H                 # res linear
                + 3 * B * H                   # cls projection + max
                + B * (QL + DL) * H)          # pooling adds
    bytes_accessed = int(B * (QL + DL) * H * in_itemsize
                         + 4 * (H * H + 3 * H + 1)
                         + 4 * (B + B * H))

    const2 = lambda b: (0, 0)

    score, feature = pl.pallas_call(
        _rank_kernel,
        grid=(G,),
        in_specs=[
            pl.BlockSpec((TB, QL, H), lambda b: (b, 0, 0)),       # q_reps tile
            pl.BlockSpec((TB, DL, H), lambda b: (b, 0, 0)),       # d_reps tile
            pl.BlockSpec((H, H), const2),                         # res W
            pl.BlockSpec((1, H), const2),                         # res b
            pl.BlockSpec((1, H), const2),                         # cls W (row)
            pl.BlockSpec((1, 1), const2),                         # cls b
        ],
        out_specs=[
            pl.BlockSpec((TB, 1), lambda b: (b, 0)),              # score
            pl.BlockSpec((TB, H), lambda b: (b, 0)),              # feature
        ],
        out_shape=[
            jax.ShapeDtypeStruct((B, 1), jnp.float32),
            jax.ShapeDtypeStruct((B, H), jnp.float32),
        ],
        compiler_params=pltpu.CompilerParams(
            dimension_semantics=("parallel",),
            vmem_limit_bytes=vmem_limit),
        cost_estimate=pl.CostEstimate(flops=flops, transcendentals=0,
                                      bytes_accessed=bytes_accessed),
    )(q_reps, d_reps, res_w, res_b_2d, cls_w_row, cls_b_2d)

    return theta, score, feature


# ----------------------------------------------------------------------------
# Pure-JAX reference for verification
# ----------------------------------------------------------------------------
def reference(rep_theta, w1, b1, w2, b2, q_reps, d_reps, res_w, res_b, cls_w, cls_b):
    theta = jnp.maximum(rep_theta @ w1 + b1, 0.0) @ w2 + b2
    x1 = jnp.mean(q_reps.astype(jnp.float32), axis=1)
    x2 = jnp.mean(d_reps.astype(jnp.float32), axis=1)
    x = jnp.maximum(x1, x2)
    feature = x @ res_w + res_b + x
    score = feature @ cls_w.reshape(-1, 1) + cls_b
    return theta, score, feature


if __name__ == "__main__":
    # Small shapes consistent with the module's forward
    B, QLEN, DLEN = 2, 8, 16
    BERT_SIZE = 128          # stand-in for 768/1024
    HSIZE = 64               # stand-in for hsize=256 (exercises the 128-pad path)
    HLEN = 10                # matches the module default hlen=10

    key = jax.random.PRNGKey(0)
    keys = jax.random.split(key, 10)

    # Deterministic synthetic parameters (Linear weights stored [in, out]).
    rep_theta = 0.02 * jax.random.normal(keys[0], (HLEN, BERT_SIZE), jnp.float32)
    rep_l1_w = 0.02 * jax.random.normal(keys[1], (BERT_SIZE, HSIZE), jnp.float32)
    rep_l1_b = 0.01 * jax.random.normal(keys[2], (HSIZE,), jnp.float32)
    rep_l2_w = 0.02 * jax.random.normal(keys[3], (HSIZE, BERT_SIZE), jnp.float32)
    rep_l2_b = 0.01 * jax.random.normal(keys[4], (BERT_SIZE,), jnp.float32)
    res_w = 0.02 * jax.random.normal(keys[5], (BERT_SIZE, BERT_SIZE), jnp.float32)
    res_b = 0.01 * jax.random.normal(keys[6], (BERT_SIZE,), jnp.float32)
    cls_w = 0.02 * jax.random.normal(keys[7], (BERT_SIZE, 1), jnp.float32)
    cls_b = jnp.zeros((1,), jnp.float32)

    # Synthetic "last-layer BERT outputs" (stand-ins for q_reps[-1], d_reps[-1]),
    # fed in bf16: the ranker is HBM-bandwidth bound, so halving q/d read traffic
    # is the dominant speedup; the kernel accumulates in f32.
    q_reps = jax.random.normal(keys[8], (B, QLEN, BERT_SIZE),
                               jnp.float32).astype(jnp.bfloat16)
    d_reps = jax.random.normal(keys[9], (B, DLEN, BERT_SIZE),
                               jnp.float32).astype(jnp.bfloat16)

    theta, score, feature = p0_twin_bert_ranker_forward(
        rep_theta, rep_l1_w, rep_l1_b, rep_l2_w, rep_l2_b,
        q_reps, d_reps, res_w, res_b, cls_w, cls_b)
    jax.block_until_ready((theta, score, feature))

    theta_r, score_r, feature_r = reference(
        rep_theta, rep_l1_w, rep_l1_b, rep_l2_w, rep_l2_b,
        q_reps, d_reps, res_w, res_b, cls_w, cls_b)
    assert jnp.allclose(theta, theta_r, atol=5e-5, rtol=5e-5)
    assert jnp.allclose(feature, feature_r, atol=5e-5, rtol=5e-5)
    assert jnp.allclose(score, score_r, atol=5e-5, rtol=5e-5)

    print("KERNEL_OK")
</pallas_src>

<mosaic_0001>
module attributes {stable_mosaic.version = 11 : i64} {
  func.func @_theta_kernel(%arg0: memref<10x128xf32, #tpu.memory_space<vmem>>, %arg1: memref<128x128xf32, #tpu.memory_space<vmem>>, %arg2: memref<1x128xf32, #tpu.memory_space<vmem>>, %arg3: memref<128x128xf32, #tpu.memory_space<vmem>>, %arg4: memref<1x128xf32, #tpu.memory_space<vmem>>, %arg5: memref<10x128xf32, #tpu.memory_space<vmem>>) attributes {dimension_semantics = [], scalar_prefetch = 0 : i64, scratch_operands = 0 : i64, tpu.core_type = #tpu.core_type<tc>} {
    %c0 = arith.constant 0 : index
    %c0_0 = arith.constant 0 : index
    %0 = vector.load %arg0[%c0, %c0_0] : memref<10x128xf32, #tpu.memory_space<vmem>>, vector<10x128xf32>
    %c0_1 = arith.constant 0 : index
    %c0_2 = arith.constant 0 : index
    %1 = vector.load %arg1[%c0_1, %c0_2] : memref<128x128xf32, #tpu.memory_space<vmem>>, vector<128x128xf32>
    %cst = arith.constant dense<0.000000e+00> : vector<10x128xf32>
    %2 = tpu.matmul %0, %1, %cst {dimension_numbers = #tpu.dot_dimension_numbers<[1], [0], [0], [1], [0, 0, 1, 1], [], []>} : vector<10x128xf32>, vector<128x128xf32>, vector<10x128xf32> -> vector<10x128xf32>
    %c0_3 = arith.constant 0 : index
    %c0_4 = arith.constant 0 : index
    %3 = vector.load %arg2[%c0_3, %c0_4] : memref<1x128xf32, #tpu.memory_space<vmem>>, vector<1x128xf32>
    %4 = vector.broadcast %3 : vector<1x128xf32> to vector<10x128xf32>
    %5 = arith.addf %2, %4 : vector<10x128xf32>
    %cst_5 = arith.constant 0.000000e+00 : f32
    %6 = vector.broadcast %cst_5 : f32 to vector<10x128xf32>
    %7 = arith.maximumf %5, %6 : vector<10x128xf32>
    %c0_6 = arith.constant 0 : index
    %c0_7 = arith.constant 0 : index
    %8 = vector.load %arg3[%c0_6, %c0_7] : memref<128x128xf32, #tpu.memory_space<vmem>>, vector<128x128xf32>
    %cst_8 = arith.constant dense<0.000000e+00> : vector<10x128xf32>
    %9 = tpu.matmul %7, %8, %cst_8 {dimension_numbers = #tpu.dot_dimension_numbers<[1], [0], [0], [1], [0, 0, 1, 1], [], []>} : vector<10x128xf32>, vector<128x128xf32>, vector<10x128xf32> -> vector<10x128xf32>
    %c0_9 = arith.constant 0 : index
    %c0_10 = arith.constant 0 : index
    %10 = vector.load %arg4[%c0_9, %c0_10] : memref<1x128xf32, #tpu.memory_space<vmem>>, vector<1x128xf32>
    %11 = vector.broadcast %10 : vector<1x128xf32> to vector<10x128xf32>
    %12 = arith.addf %9, %11 : vector<10x128xf32>
    %c0_11 = arith.constant 0 : index
    %c0_12 = arith.constant 0 : index
    %13 = vector.load %arg5[%c0_11, %c0_12] : memref<10x128xf32, #tpu.memory_space<vmem>>, vector<10x128xf32>
    tpu.vector_store %arg5[%c0_11, %c0_12], %12 {strides = array<i32>} : memref<10x128xf32, #tpu.memory_space<vmem>>, vector<10x128xf32>,
    return
  }
}

</mosaic_0001>

<bundles_post_ra>
// kernel: tpu_custom_call.1
= control target key start
LH: loop header
LB: loop body
LE: loop exit
PB: predicated region body
PF: predicated region fallthrough
CT: control target
= control target key end

     0   :  { %10 = vsyncpa [#allocation3], 0  ;;  %s663_s0 = inlined_call_operand.hbm [shape: f32[10,128], index: 0, kind: input, shape index: {}]   ;;  %s664_s1 = inlined_call_operand.hbm [shape: f32[128,128], index: 1, kind: input, shape index: {}]   ;;  %s665_s2 = inlined_call_operand.vmem [shape: f32[1,128], index: 2, kind: input, shape index: {}]   ;;  %s666_s3 = inlined_call_operand.hbm [shape: f32[128,128], index: 3, kind: input, shape index: {}]   ;;  %s667_s4 = inlined_call_operand.vmem [shape: f32[1,128], index: 4, kind: input, shape index: {}]   ;;  %s668_s5 = inlined_call_operand.hbm [shape: f32[10,128], index: 5, kind: output, shape index: {}]  }
   0x1   :  { %11 = vsyncpa [#allocation6], 0 }
   0x2   :  { %12 = vsyncpa [#allocation4], 0  ;;  %s554_s18 = smov [#allocation5]   ;;  %s555_s20 = smov [#allocation2]  }
   0x3   :  { %s30_s19 = sshll.u32 %s554_s18, 4  ;;  %s18_s21 = sshll.u32 %s555_s20, 4  ;;  %s31_s19 = int_to_ptr.vmem [resolvable:$true] %s30_s19  ;;  %s590_s21 = int_to_ptr.vmem [resolvable:$true] %s18_s21 }
   0x4   :  { %s460_s24 = scalar_lea.hbm %s664_s1, 2048 }
   0x5   :  { %p461_p0 = scmp.ne.s32.totalorder %s664_s1, %s460_s24  ;;  %p464_p1 = scmp.lt.u32.totalorder %s460_s24, %s664_s1 }
   0x7   :  { %p466_p2 = pnand %p464_p1, %p461_p0 }
   0x9   :  { %469 = shalt.err (!%p466_p2)
}
   0xa   :  { %s470_s29 = scalar_lea.vmem %s31_s19, 2048  ;;  %p475_p4 = scmp.lt.s32.totalorder %s31_s19, %s31_s19 }
   0xb   :  { %p471_p3 = scmp.ne.s32.totalorder %s31_s19, %s470_s29  ;;  %p476_p5 = scmp.lt.s32.totalorder %s470_s29, %s470_s29 }
   0xd   :  { %p477_p6 = por %p476_p5, %p475_p4 }
   0xf   :  { %p478_p7 = pnand %p477_p6, %p471_p3 }
  0x11   :  { %481 = shalt.err (!%p478_p7)
}
  0x12   :  { %s556_s30 = smov 128   ;;  %s557_s6 = smov 8  }
  0x13   :  { %36 = dma.hbm_to_vmem [thread:$0]  %s664_s1, 2048, %s31_s19, [#allocation6], %s556_s30, %s556_s30, %s557_s6  }
  0x14   :  { %s482_s11 = scalar_lea.hbm %s663_s0, 256 }
  0x15   :  { %p483_p8 = scmp.ne.s32.totalorder %s663_s0, %s482_s11  ;;  %p486_p9 = scmp.lt.u32.totalorder %s482_s11, %s663_s0 }
  0x17   :  { %p488_p10 = pnand %p486_p9, %p483_p8 }
  0x19   :  { %491 = shalt.err (!%p488_p10)
}
  0x1a   :  { %s492_s16 = scalar_lea.vmem %s590_s21, 256  ;;  %p497_p12 = scmp.lt.s32.totalorder %s590_s21, %s590_s21 }
  0x1b   :  { %p493_p11 = scmp.ne.s32.totalorder %s590_s21, %s492_s16  ;;  %p498_p13 = scmp.lt.s32.totalorder %s492_s16, %s492_s16 }
  0x1d   :  { %p499_p0 = por %p498_p13, %p497_p12 }
  0x1f   :  { %p500_p1 = pnand %p499_p0, %p493_p11 }
  0x21   :  { %503 = shalt.err (!%p500_p1)
}
  0x22   :  { %24 = dma.hbm_to_vmem [thread:$0]  %s663_s0, 256, %s590_s21, [#allocation3], %s556_s30, %s556_s30, %s557_s6  }
  0x23   :  { %s558_s18 = smov [#allocation7]   ;;  %s504_s23 = scalar_lea.hbm %s666_s3, 2048 }
  0x24   :  { %s44_s19 = sshll.u32 %s558_s18, 4  ;;  %p505_p2 = scmp.ne.s32.totalorder %s666_s3, %s504_s23  ;;  %s45_s19 = int_to_ptr.vmem [resolvable:$true] %s44_s19 }
  0x25   :  { %p508_p3 = scmp.lt.u32.totalorder %s504_s23, %s666_s3 }
  0x27   :  { %p510_p4 = pnand %p508_p3, %p505_p2 }
  0x29   :  { %513 = shalt.err (!%p510_p4)
}
  0x2a   :  { %s514_s28 = scalar_lea.vmem %s45_s19, 2048  ;;  %p519_p6 = scmp.lt.s32.totalorder %s45_s19, %s45_s19 }
  0x2b   :  { %p515_p5 = scmp.ne.s32.totalorder %s45_s19, %s514_s28  ;;  %p520_p7 = scmp.lt.s32.totalorder %s514_s28, %s514_s28 }
  0x2d   :  { %p521_p8 = por %p520_p7, %p519_p6 }
  0x2f   :  { %p522_p9 = pnand %p521_p8, %p515_p5 }
  0x31   :  { %525 = shalt.err (!%p522_p9)
}
  0x32   :  { %50 = dma.hbm_to_vmem [thread:$0]  %s666_s3, 2048, %s45_s19, [#allocation6], %s556_s30, %s556_s30, %s557_s6  }
  0x33   :  { %548 = dma.done.wait [#allocation3], 256  }
  0x34   :  { %549 = vsyncadd [#allocation3], 4294967040 }
  0x35   :  { %550 = dma.done.wait [#allocation6], 4096  }
  0x36   :  { %551 = vsyncadd [#allocation6], 4294963200  ;;  %v64_v0 = vld [vmem:[#allocation5] sm:$0xff]  ;;  %v65_v1 = vld [vmem:[#allocation5 + $0x8] sm:$0xff]  ;;  %s559_s9 = smov [#allocation8]  }
  0x37   :  { %v66_v2 = vld [vmem:[#allocation5 + $0x10] sm:$0xff]  ;;  %v390_v3 = vpack.c.bf16 %v65_v1, %v64_v0  ;;  %v67_v4 = vld [vmem:[#allocation5 + $0x18] sm:$0xff]  ;;  %v68_v6 = vld [vmem:[#allocation5 + $0x20] sm:$0xff]  ;;  %s269_s10 = sshll.u32 %s559_s9, 4  ;;  %s270_s10 = int_to_ptr.vmem [resolvable:$true] %s269_s10 }
  0x38   :  { %v394_v5 = vpack.c.bf16 %v67_v4, %v66_v2  ;;  %v69_v7 = vld [vmem:[#allocation5 + $0x28] sm:$0xff]  ;;  %v70_v9 = vld [vmem:[#allocation5 + $0x30] sm:$0xff]  ;;  %v71_v10 = vld [vmem:[#allocation5 + $0x38] sm:$0xff]  ;;  %p531_p11 = scmp.lt.s32.totalorder %s270_s10, %s270_s10 }
  0x39   :  { %391 = vmatprep.subr.bf16.mxu0 %v390_v3  ;;  %v398_v8 = vpack.c.bf16 %v69_v7, %v68_v6  ;;  %v62_v11 = vld [vmem:[#allocation2] sm:$0xff]  ;;  %v164_v12 = vld [vmem:[#allocation7] sm:$0xff]  ;;  %v165_v13 = vld [vmem:[#allocation7 + $0x8] sm:$0xff]  ;;  %v402_v20 = vpack.c.bf16 %v71_v10, %v70_v9 }
  0x3a   :  { %393 = vmatpush3.bf16.msra.mxu0 %v390_v3  ;;  %352 = vmatprep.mubr.f32.mxu0 %v62_v11  ;;  %v166_v14 = vld [vmem:[#allocation7 + $0x10] sm:$0xff]  ;;  %v422_v15 = vpack.c.bf16 %v165_v13, %v164_v12  ;;  %v167_v16 = vld [vmem:[#allocation7 + $0x18] sm:$0xff]  ;;  %v168_v18 = vld [vmem:[#allocation7 + $0x20] sm:$0xff] }
  0x3b   :  { %395 = vmatprep.subr.bf16.mxu0 %v394_v5  ;;  %v426_v17 = vpack.c.bf16 %v167_v16, %v166_v14  ;;  %v169_v19 = vld [vmem:[#allocation7 + $0x28] sm:$0xff]  ;;  %v72_v21 = vld [vmem:[#allocation5 + $0x40] sm:$0xff]  ;;  %v170_v24 = vld [vmem:[#allocation7 + $0x30] sm:$0xff] }
  0x3c   :  { %423 = vmatprep.subr.bf16.mxu1 %v422_v15  ;;  %v73_v22 = vld [vmem:[#allocation5 + $0x48] sm:$0xff]  ;;  %v430_v23 = vpack.c.bf16 %v169_v19, %v168_v18  ;;  %v171_v25 = vld [vmem:[#allocation7 + $0x38] sm:$0xff]  ;;  %v74_v27 = vld [vmem:[#allocation5 + $0x50] sm:$0xff] }
  0x3d   :  { %425 = vmatpush3.bf16.msra.mxu1 %v422_v15  ;;  %v406_v26 = vpack.c.bf16 %v73_v22, %v72_v21  ;;  %v75_v28 = vld [vmem:[#allocation5 + $0x58] sm:$0xff]  ;;  %v434_v29 = vpack.c.bf16 %v171_v25, %v170_v24  ;;  %v172_v30 = vld [vmem:[#allocation7 + $0x40] sm:$0xff]  ;;  %v173_v31 = vld [vmem:[#allocation7 + $0x48] sm:$0xff] }
  0x3e   :  { %397 = vmatpush3.bf16.msra.mxu0 %v394_v5  ;;  %427 = vmatprep.subr.bf16.mxu1 %v426_v17  ;;  %v410_v32 = vpack.c.bf16 %v75_v28, %v74_v27  ;;  %v76_v33 = vld [vmem:[#allocation5 + $0x60] sm:$0xff]  ;;  %v77_v34 = vld [vmem:[#allocation5 + $0x68] sm:$0xff]  ;;  %v438_v35 = vpack.c.bf16 %v173_v31, %v172_v30  ;;  %v174_v36 = vld [vmem:[#allocation7 + $0x50] sm:$0xff] }
  0x3f   :  { %399 = vmatprep.subr.bf16.mxu0 %v398_v8  ;;  %v175_v37 = vld [vmem:[#allocation7 + $0x58] sm:$0xff]  ;;  %v414_v38 = vpack.c.bf16 %v77_v34, %v76_v33  ;;  %v78_v39 = vld [vmem:[#allocation5 + $0x70] sm:$0xff]  ;;  %v176_v42 = vld [vmem:[#allocation7 + $0x60] sm:$0xff] }
  0x40   :  { %v79_v40 = vld [vmem:[#allocation5 + $0x78] sm:$0xff]  ;;  %v442_v41 = vpack.c.bf16 %v175_v37, %v174_v36  ;;  %v177_v43 = vld [vmem:[#allocation7 + $0x68] sm:$0xff]  ;;  %v178_v47 = vld [vmem:[#allocation7 + $0x70] sm:$0xff] }
  0x41   :  { %429 = vmatpush3.bf16.msra.mxu1 %v426_v17  ;;  %v418_v44 = vpack.c.bf16 %v79_v40, %v78_v39  ;;  %v446_v45 = vpack.c.bf16 %v177_v43, %v176_v42  ;;  %v63_v46 = vld [vmem:[#allocation2 + $0x8] sm:$0x3]  ;;  %v282_v50 = vld [vmem:[%s665_s2] ss:$0 sm:$0xff]  ;;  %s526_s2 = scalar_lea.vmem %s270_s10, 256 }
  0x42   :  { %401 = vmatpush3.bf16.msra.mxu0 %v398_v8  ;;  %431 = vmatprep.subr.bf16.mxu1 %v430_v23  ;;  %v179_v48 = vld [vmem:[#allocation7 + $0x78] sm:$0xff]  ;;  %v283_v57 = vld [vmem:[%s667_s4] ss:$0 sm:$0xff]  ;;  %p527_p10 = scmp.ne.s32.totalorder %s270_s10, %s526_s2  ;;  %p532_p12 = scmp.lt.s32.totalorder %s526_s2, %s526_s2 }
  0x43   :  { %403 = vmatprep.subr.bf16.mxu0 %v402_v20  ;;  %v450_v49 = vpack.c.bf16 %v179_v48, %v178_v47 }
  0x44   :  { %p533_p13 = por %p532_p12, %p531_p11 }
  0x45   :  { %433 = vmatpush3.bf16.msra.mxu1 %v430_v23 }
  0x46   :  { %405 = vmatpush3.bf16.msra.mxu0 %v402_v20  ;;  %435 = vmatprep.subr.bf16.mxu1 %v434_v29  ;;  %p534_p0 = pnand %p533_p13, %p527_p10 }
  0x47   :  { %407 = vmatprep.subr.bf16.mxu0 %v406_v26 }
  0x49   :  { %437 = vmatpush3.bf16.msra.mxu1 %v434_v29 }
  0x4a   :  { %409 = vmatpush3.bf16.msra.mxu0 %v406_v26  ;;  %439 = vmatprep.subr.bf16.mxu1 %v438_v35 }
  0x4b   :  { %411 = vmatprep.subr.bf16.mxu0 %v410_v32 }
  0x4d   :  { %441 = vmatpush3.bf16.msra.mxu1 %v438_v35 }
  0x4e   :  { %413 = vmatpush3.bf16.msra.mxu0 %v410_v32  ;;  %443 = vmatprep.subr.bf16.mxu1 %v442_v41 }
  0x4f   :  { %415 = vmatprep.subr.bf16.mxu0 %v414_v38 }
  0x51   :  { %445 = vmatpush3.bf16.msra.mxu1 %v442_v41 }
  0x52   :  { %417 = vmatpush3.bf16.msra.mxu0 %v414_v38  ;;  %447 = vmatprep.subr.bf16.mxu1 %v446_v45 }
  0x53   :  { %419 = vmatprep.subr.bf16.mxu0 %v418_v44 }
  0x55   :  { %449 = vmatpush3.bf16.msra.mxu1 %v446_v45 }
  0x56   :  { %421 = vmatpush3.bf16.msra.mxu0 %v418_v44  ;;  %451 = vmatprep.subr.bf16.mxu1 %v450_v49 }
  0x59   :  { %353 = vmatmul.mubr.f32.vlgmr.msra.gmra.mrb[0].mxu0 %v63_v46  ;;  %453 = vmatpush3.bf16.msra.mxu1 %v450_v49 }
 0x12c   :  { %v354_v51 = vpop.f32.mrb[0].mxu0 }
 0x12d   :  { %v159_v52 = vadd.f32 %v354_v51, %v282_v50  ;;  %v153_v53 = vpop.f32.mrb[1].mxu0 }
 0x12e   :  { %v154_v54 = vadd.f32 %v282_v50, %v153_v53 }
 0x12f   :  { %v163_v56 = vmax.f32 %v159_v52, 0.0 }
 0x130   :  { %v162_v55 = vmax.f32 %v154_v54, 0.0 }
 0x132   :  { %387 = vmatprep.mubr.f32.mxu1 %v162_v55 }
 0x133   :  { %388 = vmatmul.mubr.f32.vlgmr.msra.gmra.mrb[0].mxu1 %v163_v56 }
 0x206   :  { %v389_v58 = vpop.f32.mrb[0].mxu1 }
 0x207   :  { %v259_v59 = vadd.f32 %v389_v58, %v283_v57  ;;  %v253_v60 = vpop.f32.mrb[1].mxu1 }
 0x208   :  { %v254_v61 = vadd.f32 %v283_v57, %v253_v60 }
 0x209   :  { %263 = vst [vmem:[#allocation8 + $0x8] sm:$0x3] %v259_v59 }
 0x20a   :  { %262 = vst [vmem:[#allocation8] sm:$0xff] %v254_v61 }
 0x20b   :  { %537 = shalt.err (!%p534_p0)
}
 0x20c   :  { %s538_s4 = scalar_lea.hbm %s668_s5, 256 }
 0x20d   :  { %p539_p1 = scmp.ne.s32.totalorder %s668_s5, %s538_s4  ;;  %p542_p2 = scmp.lt.u32.totalorder %s538_s4, %s668_s5 }
 0x20f   :  { %p544_p3 = pnand %p542_p2, %p539_p1 }
 0x211   :  { %547 = shalt.err (!%p544_p3)
}
 0x212   :  { %275 = dma.vmem_to_hbm [thread:$0]  %s270_s10, 256, %s668_s5, [#allocation4], %s556_s30, %s556_s30, %s557_s6  }
 0x213   :  { %552 = dma.done.wait [#allocation4], 256  }
 0x214   :  { %553 = vsyncadd [#allocation4], 4294967040 }
 0x215   :  { %279 = vsyncpa [#allocation3], 1 }
 0x216   :  { %280 = vsyncpa [#allocation6], 1 }
 0x217   :  { %281 = vsyncpa [#allocation4], 1 }

</bundles_post_ra>
